<compile_context>
chip_gen: v6e
topology: v6e:2x2x1
jax: 0.10.0
libtpu: 0.0.40
codegen_flags: <defaults>
</compile_context>

<pallas_src>
import functools

import jax
import jax.numpy as jnp
from jax.experimental import pallas as pl
from jax.experimental.pallas import tpu as pltpu


# ------------------------------ packing layout --------------------------------

_LOGIT_LANES = 128   # lane-dense fc2 output width (num_classes=2 padded to 128)
_OUT_ROWS = 16       # sublane-dense output rows (>= graphs per mini-batch)
_W_ALIGN = 16        # bf16 sublane tile


def _round_up(v, m):
    return (v + m - 1) // m * m


def _weight_layout(num_roi, hid, n_nodes):
    """Static (row_offset, rows, cols) for every region of the packed bf16 slab."""
    shapes = [
        ("w11", num_roi, hid),                 # conv1 mlp linear 1
        ("w12", hid, hid),                     # conv1 mlp linear 2
        ("w21", hid, hid),                     # conv2 mlp linear 1
        ("w22", hid, hid),                     # conv2 mlp linear 2
        ("w3mat", hid, num_roi * num_roi),     # fc1 (BN folded), reshape-free form
        ("fc2w", num_roi, _LOGIT_LANES),       # fc2, lane padded
        ("mflat", n_nodes, num_roi * num_roi), # own-row-block mask (0/1)
        ("rsum", num_roi * num_roi, num_roi),  # fold over r groups (0/1)
        ("g", _OUT_ROWS, n_nodes),             # per-graph row-sum selector (0/1)
    ]
    lay, off = {}, 0
    for name, r, c in shapes:
        lay[name] = (off, r, c)
        off += _round_up(r, _W_ALIGN)
    lanes = _round_up(max(c for _, _, c in shapes), 128)
    return lay, off, lanes


# ------------------------------- Pallas kernel --------------------------------

def fused_gin_kernel(adj_ref, x_ref, w_ref, b_ref, o_ref, *, lay, hid, num_roi):
    """conv1 -> relu -> conv2 -> relu -> fc1(+BN folded) -> relu -> fc2 (one mini-batch).

    adj_ref already contains A + (1+eps)*I, so each GINConv aggregation is one dot.
    The PyTorch `x.reshape(-1, num_roi*hid)` + fc1 is computed reshape-free as
        z = G @ (((y2 @ W3mat) * Mflat) @ Rsum) + b1'
    with W3mat/Mflat/Rsum/G packed (host-side) into the single weight slab.
    All dot inputs are bf16 (MXU native); accumulation and elementwise math are f32.
    """
    f32, bf16 = jnp.float32, jnp.bfloat16

    def W(name):
        off, r, c = lay[name]
        return w_ref[off:off + r, :c]

    adj = adj_ref[0]                               # [N, N]  bf16 (self-loop folded in)
    x = x_ref[0]                                   # [N, nr] bf16

    b11 = b_ref[0:1, :hid]
    b12 = b_ref[1:2, :hid]
    b21 = b_ref[2:3, :hid]
    b22 = b_ref[3:4, :hid]
    b1p = b_ref[4:5, :num_roi]
    b4 = b_ref[5:6, :]

    # ---- conv1: A_hat @ x -> Linear -> ReLU -> Linear, then outer F.relu
    h = jnp.dot(adj, x, preferred_element_type=f32).astype(bf16)
    h = jnp.dot(h, W("w11"), preferred_element_type=f32) + b11
    h = jnp.maximum(h, 0.0).astype(bf16)
    h = jnp.dot(h, W("w12"), preferred_element_type=f32) + b12
    y1 = jnp.maximum(h, 0.0).astype(bf16)          # [N, hid]

    # ---- conv2 (inter-conv dropout = identity in eval)
    h = jnp.dot(adj, y1, preferred_element_type=f32).astype(bf16)
    h = jnp.dot(h, W("w21"), preferred_element_type=f32) + b21
    h = jnp.maximum(h, 0.0).astype(bf16)
    h = jnp.dot(h, W("w22"), preferred_element_type=f32) + b22
    y2 = jnp.maximum(h, 0.0).astype(bf16)           # [N, hid]

    # ---- head: fc1 (BN folded, reshape-free) -> ReLU -> fc2
    pall = jnp.dot(y2, W("w3mat"), preferred_element_type=f32)          # [N, nr*nr] f32
    masked = (pall * W("mflat").astype(f32)).astype(bf16)               # f32 mask, one cast
    q = jnp.dot(masked, W("rsum"), preferred_element_type=f32).astype(bf16)  # [N, nr]
    z = jnp.dot(W("g"), q, preferred_element_type=f32) + b1p            # [16, nr] per-graph sum
    z = jnp.maximum(z, 0.0).astype(bf16)
    # TODO(synk): training-mode dropout (p=0.6 / dropout_ratio; the PyTorch F.dropout after
    # bn1 even defaults to training=True) is not implemented; deterministic eval = identity.
    logits = jnp.dot(z, W("fc2w"), preferred_element_type=f32) + b4     # [16, 128]
    o_ref[0] = logits.astype(o_ref.dtype)            # sublane/lane-dense store


# --------------------------------- wrappers ------------------------------------

def prepare_inference_params(params, num_roi, hid, n_nodes, bn_eps=1e-5):
    """Host-side, once: fold BN into fc1, build reshape-free fc1 operands, and pack
    every bf16 matmul operand into one slab + every f32 bias into one [8,128] block."""
    f32, bf16 = jnp.float32, jnp.bfloat16
    batch = n_nodes // num_roi
    num_classes = params["fc2_w"].shape[1]
    assert batch <= _OUT_ROWS and hid <= 128 and num_roi <= 128

    # Fold BatchNorm1d (eval) into fc1: y = (x@W1 + b1 - mean)*s + beta, s = gamma*rsqrt(var+eps)
    s = params["bn_gamma"] * jax.lax.rsqrt(params["bn_var"] + bn_eps)        # [1, nr]
    fc1_w = params["fc1_w"] * s
    b1p = (params["fc1_b"] - params["bn_mean"]) * s + params["bn_beta"]      # [1, nr]

    # Reshape-free fc1: z[b,j] = sum_{r,k} y2[b*nr+r,k] * fc1_w[r*hid+k,j]
    #                         = ( G @ (((y2 @ W3mat) * Mflat) @ Rsum) )[b,j]
    w3 = fc1_w.reshape(num_roi, hid, num_roi)                                # W3[r,k,j]
    w3mat = jnp.transpose(w3, (1, 0, 2)).reshape(hid, num_roi * num_roi)     # [hid, nr*nr]
    node = jnp.arange(n_nodes)
    col = jnp.arange(num_roi * num_roi)
    mflat = (col[None, :] // num_roi == (node % num_roi)[:, None]).astype(f32)   # [N, nr*nr]
    rsum = jnp.tile(jnp.eye(num_roi, dtype=f32), (num_roi, 1))               # [nr*nr, nr]
    g = jnp.zeros((_OUT_ROWS, n_nodes), f32).at[:batch].set(
        (node[None, :] // num_roi == jnp.arange(batch)[:, None]).astype(f32))

    # fc2 padded to a lane-dense width.
    fc2_w = jnp.zeros((num_roi, _LOGIT_LANES), f32).at[:, :num_classes].set(params["fc2_w"])
    fc2_b = jnp.zeros((1, _LOGIT_LANES), f32).at[:, :num_classes].set(params["fc2_b"])

    # ---- single bf16 weight slab (one DMA, stays VMEM-resident across the grid).
    lay, rows, lanes = _weight_layout(num_roi, hid, n_nodes)
    slab = jnp.zeros((rows, lanes), bf16)

    def put(sl, name, val):
        off, r, c = lay[name]
        return sl.at[off:off + r, :c].set(val.astype(bf16))

    slab = put(slab, "w11", params["c1_w1"])
    slab = put(slab, "w12", params["c1_w2"])
    slab = put(slab, "w21", params["c2_w1"])
    slab = put(slab, "w22", params["c2_w2"])
    slab = put(slab, "w3mat", w3mat)
    slab = put(slab, "fc2w", fc2_w)
    slab = put(slab, "mflat", mflat)
    slab = put(slab, "rsum", rsum)
    slab = put(slab, "g", g)

    # ---- single f32 bias block (one vreg).
    biases = jnp.zeros((8, 128), f32)
    biases = biases.at[0, :hid].set(params["c1_b1"][0])
    biases = biases.at[1, :hid].set(params["c1_b2"][0])
    biases = biases.at[2, :hid].set(params["c2_b1"][0])
    biases = biases.at[3, :hid].set(params["c2_b2"][0])
    biases = biases.at[4, :num_roi].set(b1p[0])
    biases = biases.at[5, :].set(fc2_b[0])

    return dict(w_slab=slab, b_slab=biases, layout=lay,
                num_roi=num_roi, hid=hid, batch=batch, n_nodes=n_nodes,
                num_classes=num_classes)


def gin_forward(prep, x, adj, eps=0.0):
    """Fused GIN forward (inference).

    x:   [G, N, numROI] or [N, numROI]
    adj: [G, N, N]      or [N, N]   with A[i, j] = #edges j -> i
    Returns logits [G, graphs_per_batch, num_classes] (or 2-D if x was 2-D).
    """
    squeeze = (x.ndim == 2)
    if squeeze:
        x, adj = x[None], adj[None]
    bf16 = jnp.bfloat16
    n, nr, hid, b = prep["n_nodes"], prep["num_roi"], prep["hid"], prep["batch"]
    G = x.shape[0]

    # Fold the GIN self-term into the adjacency: one dot per conv inside the kernel.
    adj_hat = (adj.astype(jnp.float32)
               + (1.0 + float(eps)) * jnp.eye(n, dtype=jnp.float32)).astype(bf16)
    x = x.astype(bf16)

    w_rows, w_lanes = prep["w_slab"].shape

    flops = 2 * G * (n * n * nr + n * nr * hid + n * hid * hid           # conv1
                     + n * n * hid + 2 * n * hid * hid                   # conv2
                     + n * hid * nr * nr + n * nr * nr * nr              # fc1 trio
                     + _OUT_ROWS * n * nr + _OUT_ROWS * nr * _LOGIT_LANES)  # pool + fc2
    bytes_accessed = int((adj_hat.size + x.size) * 2 + prep["w_slab"].size * 2
                         + prep["b_slab"].size * 4 + G * _OUT_ROWS * _LOGIT_LANES * 4)

    kernel = functools.partial(fused_gin_kernel, lay=prep["layout"], hid=hid, num_roi=nr)

    out = pl.pallas_call(
        kernel,
        out_shape=jax.ShapeDtypeStruct((G, _OUT_ROWS, _LOGIT_LANES), jnp.float32),
        grid_spec=pltpu.PrefetchScalarGridSpec(
            num_scalar_prefetch=0,
            grid=(G,),
            in_specs=[
                pl.BlockSpec((1, n, n), lambda i: (i, 0, 0)),         # adj_hat: per-step block
                pl.BlockSpec((1, n, nr), lambda i: (i, 0, 0)),        # x: per-step block
                pl.BlockSpec((w_rows, w_lanes), lambda i: (0, 0)),    # weight slab: resident
                pl.BlockSpec((8, 128), lambda i: (0, 0)),             # bias block: resident
            ],
            out_specs=pl.BlockSpec((1, _OUT_ROWS, _LOGIT_LANES), lambda i: (i, 0, 0)),
        ),
        compiler_params=pltpu.CompilerParams(
            dimension_semantics=("parallel",),      # v7x: split mini-batches across both TCs
            vmem_limit_bytes=4 * 1024 * 1024),
        cost_estimate=pl.CostEstimate(flops=flops, transcendentals=0,
                                      bytes_accessed=bytes_accessed),
    )(adj_hat, x, prep["w_slab"], prep["b_slab"])

    logits = out[:, :b, :prep["num_classes"]]
    return logits[0] if squeeze else logits


# ----------------------------- reference & setup --------------------------------

def gin_reference(params, x, adj, num_roi, hid, eps=0.0, bn_eps=1e-5):
    """Pure-JAX f32 eval-mode reference matching the PyTorch forward."""
    def mlp(h, w1, b1, w2, b2):
        return jnp.maximum(h @ w1 + b1, 0.0) @ w2 + b2

    h = (1.0 + eps) * x + adj @ x
    h = jnp.maximum(mlp(h, params["c1_w1"], params["c1_b1"],
                        params["c1_w2"], params["c1_b2"]), 0.0)
    h2 = (1.0 + eps) * h + adj @ h
    h2 = jnp.maximum(mlp(h2, params["c2_w1"], params["c2_b1"],
                         params["c2_w2"], params["c2_b2"]), 0.0)
    out = h2.reshape(-1, num_roi * hid)
    z = out @ params["fc1_w"] + params["fc1_b"]
    z = (z - params["bn_mean"]) * jax.lax.rsqrt(params["bn_var"] + bn_eps) \
        * params["bn_gamma"] + params["bn_beta"]
    z = jnp.maximum(z, 0.0)
    return z @ params["fc2_w"] + params["fc2_b"]


def init_params(key, num_roi, hid):
    ks = jax.random.split(key, 8)

    def lin(k, fan_in, fan_out):
        bound = 1.0 / jnp.sqrt(fan_in)
        kw, kb = jax.random.split(k)
        w = jax.random.uniform(kw, (fan_in, fan_out), jnp.float32, -bound, bound)
        b = jax.random.uniform(kb, (1, fan_out), jnp.float32, -bound, bound)
        return w, b

    c1_w1, c1_b1 = lin(ks[0], num_roi, hid)
    c1_w2, c1_b2 = lin(ks[1], hid, hid)
    c2_w1, c2_b1 = lin(ks[2], hid, hid)
    c2_w2, c2_b2 = lin(ks[3], hid, hid)
    fc1_w, fc1_b = lin(ks[4], num_roi * hid, num_roi)
    fc2_w, fc2_b = lin(ks[5], num_roi, 2)

    return dict(
        c1_w1=c1_w1, c1_b1=c1_b1, c1_w2=c1_w2, c1_b2=c1_b2,
        c2_w1=c2_w1, c2_b1=c2_b1, c2_w2=c2_w2, c2_b2=c2_b2,
        fc1_w=fc1_w, fc1_b=fc1_b, fc2_w=fc2_w, fc2_b=fc2_b,
        bn_gamma=jnp.ones((1, num_roi), jnp.float32),
        bn_beta=jnp.zeros((1, num_roi), jnp.float32),
        bn_mean=jnp.zeros((1, num_roi), jnp.float32),
        bn_var=jnp.ones((1, num_roi), jnp.float32),
    )


def edge_index_to_dense_adj(edge_index, n):
    """A[i, j] = number of edges j -> i  (GINConv sum aggregation: agg = A @ x)."""
    src, dst = edge_index[0], edge_index[1]
    a = jnp.zeros((n, n), jnp.float32)
    return a.at[dst, src].add(1.0)


# ------------------------------------ demo --------------------------------------

if __name__ == "__main__":
    NUM_ROI = 16   # args.numROI
    HID = 32       # hid
    BATCH = 2      # graphs per mini-batch; each graph has NUM_ROI nodes
    N = BATCH * NUM_ROI
    G = 4          # mini-batches processed per kernel launch (grid axis)

    key = jax.random.PRNGKey(0)
    k_param, k_x = jax.random.split(key)

    params = init_params(k_param, NUM_ROI, HID)
    prep = prepare_inference_params(params, NUM_ROI, HID, N)

    # Node features: data.x is [N, numROI] per mini-batch.
    xs = jax.random.normal(k_x, (G, N, NUM_ROI), jnp.float32)

    # Deterministic bidirectional ring inside each graph (data.edge_index [2, E]).
    srcs, dsts = [], []
    for gph in range(BATCH):
        base = gph * NUM_ROI
        for i in range(NUM_ROI):
            j = (i + 1) % NUM_ROI
            srcs += [base + i, base + j]
            dsts += [base + j, base + i]
    edge_index = jnp.array([srcs, dsts], dtype=jnp.int32)
    adj = edge_index_to_dense_adj(edge_index, N)
    adjs = jnp.broadcast_to(adj, (G, N, N))

    logits = gin_forward(prep, xs, adjs)
    jax.block_until_ready(logits)
    assert logits.shape == (G, BATCH, 2) and logits.dtype == jnp.float32

    # Tolerance check vs. f32 reference (bf16 matmul inputs -> ~1e-2 expected error).
    ref = jax.vmap(lambda xv, av: gin_reference(params, xv, av, NUM_ROI, HID))(xs, adjs)
    err = float(jnp.max(jnp.abs(logits - ref)))
    assert err < 1e-1, f"max abs err too large: {err}"

    print("KERNEL_OK")
</pallas_src>

<mosaic_0001>
module attributes {stable_mosaic.version = 11 : i64} {
  func.func @fused_gin_kernel(%arg0: i32, %arg1: memref<1x32x32xbf16, #tpu.memory_space<vmem>>, %arg2: memref<1x32x16xbf16, #tpu.memory_space<vmem>>, %arg3: memref<464x256xbf16, #tpu.memory_space<vmem>>, %arg4: memref<8x128xf32, #tpu.memory_space<vmem>>, %arg5: memref<1x16x128xf32, #tpu.memory_space<vmem>>) attributes {dimension_semantics = [#tpu.dimension_semantics<parallel>], iteration_bounds = array<i64: 4>, scalar_prefetch = 0 : i64, scratch_operands = 0 : i64, tpu.core_type = #tpu.core_type<tc>, window_params = [{transform_indices = @transform_0, window_bounds = array<i64: 1, 32, 32>}, {transform_indices = @transform_1, window_bounds = array<i64: 1, 32, 16>}, {pipeline_mode = #tpu.pipeline_mode<synchronous>, transform_indices = @transform_2, window_bounds = array<i64: 464, 256>}, {pipeline_mode = #tpu.pipeline_mode<synchronous>, transform_indices = @transform_3, window_bounds = array<i64: 8, 128>}, {transform_indices = @transform_4, window_bounds = array<i64: 1, 16, 128>}]} {
    %c0 = arith.constant 0 : index
    %c0_0 = arith.constant 0 : index
    %c0_1 = arith.constant 0 : index
    %0 = vector.load %arg1[%c0, %c0_0, %c0_1] : memref<1x32x32xbf16, #tpu.memory_space<vmem>>, vector<1x32x32xbf16>
    %1 = vector.shape_cast %0 : vector<1x32x32xbf16> to vector<32x32xbf16>
    %c0_2 = arith.constant 0 : index
    %c0_3 = arith.constant 0 : index
    %c0_4 = arith.constant 0 : index
    %2 = vector.load %arg2[%c0_2, %c0_3, %c0_4] : memref<1x32x16xbf16, #tpu.memory_space<vmem>>, vector<1x32x16xbf16>
    %3 = vector.shape_cast %2 : vector<1x32x16xbf16> to vector<32x16xbf16>
    %c0_5 = arith.constant 0 : index
    %c0_6 = arith.constant 0 : index
    %4 = vector.load %arg4[%c0_5, %c0_6] : memref<8x128xf32, #tpu.memory_space<vmem>>, vector<1x32xf32>
    %c1 = arith.constant 1 : index
    %c0_7 = arith.constant 0 : index
    %5 = vector.load %arg4[%c1, %c0_7] : memref<8x128xf32, #tpu.memory_space<vmem>>, vector<1x32xf32>
    %c2 = arith.constant 2 : index
    %c0_8 = arith.constant 0 : index
    %6 = vector.load %arg4[%c2, %c0_8] : memref<8x128xf32, #tpu.memory_space<vmem>>, vector<1x32xf32>
    %c3 = arith.constant 3 : index
    %c0_9 = arith.constant 0 : index
    %7 = vector.load %arg4[%c3, %c0_9] : memref<8x128xf32, #tpu.memory_space<vmem>>, vector<1x32xf32>
    %c4 = arith.constant 4 : index
    %c0_10 = arith.constant 0 : index
    %8 = vector.load %arg4[%c4, %c0_10] : memref<8x128xf32, #tpu.memory_space<vmem>>, vector<1x16xf32>
    %c5 = arith.constant 5 : index
    %c0_11 = arith.constant 0 : index
    %9 = vector.load %arg4[%c5, %c0_11] : memref<8x128xf32, #tpu.memory_space<vmem>>, vector<1x128xf32>
    %cst = arith.constant dense<0.000000e+00> : vector<32x16xf32>
    %10 = tpu.matmul %1, %3, %cst {dimension_numbers = #tpu.dot_dimension_numbers<[1], [0], [0], [1], [0, 0, 1, 1], [], []>} : vector<32x32xbf16>, vector<32x16xbf16>, vector<32x16xf32> -> vector<32x16xf32>
    %11 = arith.truncf %10 : vector<32x16xf32> to vector<32x16xbf16>
    %c0_12 = arith.constant 0 : index
    %c0_13 = arith.constant 0 : index
    %12 = vector.load %arg3[%c0_12, %c0_13] : memref<464x256xbf16, #tpu.memory_space<vmem>>, vector<16x32xbf16>
    %cst_14 = arith.constant dense<0.000000e+00> : vector<32x32xf32>
    %13 = tpu.matmul %11, %12, %cst_14 {dimension_numbers = #tpu.dot_dimension_numbers<[1], [0], [0], [1], [0, 0, 1, 1], [], []>} : vector<32x16xbf16>, vector<16x32xbf16>, vector<32x32xf32> -> vector<32x32xf32>
    %14 = vector.broadcast %4 : vector<1x32xf32> to vector<32x32xf32>
    %15 = arith.addf %13, %14 : vector<32x32xf32>
    %cst_15 = arith.constant 0.000000e+00 : f32
    %16 = vector.broadcast %cst_15 : f32 to vector<32x32xf32>
    %17 = arith.maximumf %15, %16 : vector<32x32xf32>
    %18 = arith.truncf %17 : vector<32x32xf32> to vector<32x32xbf16>
    %c16 = arith.constant 16 : index
    %c0_16 = arith.constant 0 : index
    %19 = vector.load %arg3[%c16, %c0_16] : memref<464x256xbf16, #tpu.memory_space<vmem>>, vector<32x32xbf16>
    %cst_17 = arith.constant dense<0.000000e+00> : vector<32x32xf32>
    %20 = tpu.matmul %18, %19, %cst_17 {dimension_numbers = #tpu.dot_dimension_numbers<[1], [0], [0], [1], [0, 0, 1, 1], [], []>} : vector<32x32xbf16>, vector<32x32xbf16>, vector<32x32xf32> -> vector<32x32xf32>
    %21 = vector.broadcast %5 : vector<1x32xf32> to vector<32x32xf32>
    %22 = arith.addf %20, %21 : vector<32x32xf32>
    %cst_18 = arith.constant 0.000000e+00 : f32
    %23 = vector.broadcast %cst_18 : f32 to vector<32x32xf32>
    %24 = arith.maximumf %22, %23 : vector<32x32xf32>
    %25 = arith.truncf %24 : vector<32x32xf32> to vector<32x32xbf16>
    %cst_19 = arith.constant dense<0.000000e+00> : vector<32x32xf32>
    %26 = tpu.matmul %1, %25, %cst_19 {dimension_numbers = #tpu.dot_dimension_numbers<[1], [0], [0], [1], [0, 0, 1, 1], [], []>} : vector<32x32xbf16>, vector<32x32xbf16>, vector<32x32xf32> -> vector<32x32xf32>
    %27 = arith.truncf %26 : vector<32x32xf32> to vector<32x32xbf16>
    %c48 = arith.constant 48 : index
    %c0_20 = arith.constant 0 : index
    %28 = vector.load %arg3[%c48, %c0_20] : memref<464x256xbf16, #tpu.memory_space<vmem>>, vector<32x32xbf16>
    %cst_21 = arith.constant dense<0.000000e+00> : vector<32x32xf32>
    %29 = tpu.matmul %27, %28, %cst_21 {dimension_numbers = #tpu.dot_dimension_numbers<[1], [0], [0], [1], [0, 0, 1, 1], [], []>} : vector<32x32xbf16>, vector<32x32xbf16>, vector<32x32xf32> -> vector<32x32xf32>
    %30 = vector.broadcast %6 : vector<1x32xf32> to vector<32x32xf32>
    %31 = arith.addf %29, %30 : vector<32x32xf32>
    %cst_22 = arith.constant 0.000000e+00 : f32
    %32 = vector.broadcast %cst_22 : f32 to vector<32x32xf32>
    %33 = arith.maximumf %31, %32 : vector<32x32xf32>
    %34 = arith.truncf %33 : vector<32x32xf32> to vector<32x32xbf16>
    %c80 = arith.constant 80 : index
    %c0_23 = arith.constant 0 : index
    %35 = vector.load %arg3[%c80, %c0_23] : memref<464x256xbf16, #tpu.memory_space<vmem>>, vector<32x32xbf16>
    %cst_24 = arith.constant dense<0.000000e+00> : vector<32x32xf32>
    %36 = tpu.matmul %34, %35, %cst_24 {dimension_numbers = #tpu.dot_dimension_numbers<[1], [0], [0], [1], [0, 0, 1, 1], [], []>} : vector<32x32xbf16>, vector<32x32xbf16>, vector<32x32xf32> -> vector<32x32xf32>
    %37 = vector.broadcast %7 : vector<1x32xf32> to vector<32x32xf32>
    %38 = arith.addf %36, %37 : vector<32x32xf32>
    %cst_25 = arith.constant 0.000000e+00 : f32
    %39 = vector.broadcast %cst_25 : f32 to vector<32x32xf32>
    %40 = arith.maximumf %38, %39 : vector<32x32xf32>
    %41 = arith.truncf %40 : vector<32x32xf32> to vector<32x32xbf16>
    %c112 = arith.constant 112 : index
    %c0_26 = arith.constant 0 : index
    %42 = vector.load %arg3[%c112, %c0_26] : memref<464x256xbf16, #tpu.memory_space<vmem>>, vector<32x256xbf16>
    %cst_27 = arith.constant dense<0.000000e+00> : vector<32x256xf32>
    %43 = tpu.matmul %41, %42, %cst_27 {dimension_numbers = #tpu.dot_dimension_numbers<[1], [0], [0], [1], [0, 0, 1, 1], [], []>} : vector<32x32xbf16>, vector<32x256xbf16>, vector<32x256xf32> -> vector<32x256xf32>
    %c160 = arith.constant 160 : index
    %c0_28 = arith.constant 0 : index
    %44 = vector.load %arg3[%c160, %c0_28] : memref<464x256xbf16, #tpu.memory_space<vmem>>, vector<32x256xbf16>
    %45 = arith.extf %44 : vector<32x256xbf16> to vector<32x256xf32>
    %46 = arith.mulf %43, %45 : vector<32x256xf32>
    %47 = arith.truncf %46 : vector<32x256xf32> to vector<32x256xbf16>
    %c192 = arith.constant 192 : index
    %c0_29 = arith.constant 0 : index
    %48 = vector.load %arg3[%c192, %c0_29] : memref<464x256xbf16, #tpu.memory_space<vmem>>, vector<256x16xbf16>
    %cst_30 = arith.constant dense<0.000000e+00> : vector<32x16xf32>
    %49 = tpu.matmul %47, %48, %cst_30 {dimension_numbers = #tpu.dot_dimension_numbers<[1], [0], [0], [1], [0, 0, 1, 1], [], []>} : vector<32x256xbf16>, vector<256x16xbf16>, vector<32x16xf32> -> vector<32x16xf32>
    %50 = arith.truncf %49 : vector<32x16xf32> to vector<32x16xbf16>
    %c448 = arith.constant 448 : index
    %c0_31 = arith.constant 0 : index
    %51 = vector.load %arg3[%c448, %c0_31] : memref<464x256xbf16, #tpu.memory_space<vmem>>, vector<16x32xbf16>
    %cst_32 = arith.constant dense<0.000000e+00> : vector<16x16xf32>
    %52 = tpu.matmul %51, %50, %cst_32 {dimension_numbers = #tpu.dot_dimension_numbers<[1], [0], [0], [1], [0, 0, 1, 1], [], []>} : vector<16x32xbf16>, vector<32x16xbf16>, vector<16x16xf32> -> vector<16x16xf32>
    %53 = vector.broadcast %8 : vector<1x16xf32> to vector<16x16xf32>
    %54 = arith.addf %52, %53 : vector<16x16xf32>
    %cst_33 = arith.constant 0.000000e+00 : f32
    %55 = vector.broadcast %cst_33 : f32 to vector<16x16xf32>
    %56 = arith.maximumf %54, %55 : vector<16x16xf32>
    %57 = arith.truncf %56 : vector<16x16xf32> to vector<16x16xbf16>
    %c144 = arith.constant 144 : index
    %c0_34 = arith.constant 0 : index
    %58 = vector.load %arg3[%c144, %c0_34] : memref<464x256xbf16, #tpu.memory_space<vmem>>, vector<16x128xbf16>
    %cst_35 = arith.constant dense<0.000000e+00> : vector<16x128xf32>
    %59 = tpu.matmul %57, %58, %cst_35 {dimension_numbers = #tpu.dot_dimension_numbers<[1], [0], [0], [1], [0, 0, 1, 1], [], []>} : vector<16x16xbf16>, vector<16x128xbf16>, vector<16x128xf32> -> vector<16x128xf32>
    %60 = vector.broadcast %9 : vector<1x128xf32> to vector<16x128xf32>
    %61 = arith.addf %59, %60 : vector<16x128xf32>
    %c0_36 = arith.constant 0 : index
    %c0_37 = arith.constant 0 : index
    %c0_38 = arith.constant 0 : index
    %62 = vector.load %arg5[%c0_36, %c0_37, %c0_38] : memref<1x16x128xf32, #tpu.memory_space<vmem>>, vector<1x16x128xf32>
    %63 = vector.shape_cast %62 : vector<1x16x128xf32> to vector<16x128xf32>
    %64 = vector.shape_cast %61 : vector<16x128xf32> to vector<1x16x128xf32>
    tpu.vector_store %arg5[%c0_36, %c0_37, %c0_38], %64 {strides = array<i32>} : memref<1x16x128xf32, #tpu.memory_space<vmem>>, vector<1x16x128xf32>,
    return
  }
  func.func @transform_0(%arg0: i32) -> (i32, i32, i32) {
    %c0_i32 = arith.constant 0 : i32
    %c0_i32_0 = arith.constant 0 : i32
    %c0_i32_1 = arith.constant 0 : i32
    return %arg0, %c0_i32, %c0_i32_0 : i32, i32, i32
  }
  func.func @transform_1(%arg0: i32) -> (i32, i32, i32) {
    %c0_i32 = arith.constant 0 : i32
    %c0_i32_0 = arith.constant 0 : i32
    %c0_i32_1 = arith.constant 0 : i32
    return %arg0, %c0_i32, %c0_i32_0 : i32, i32, i32
  }
  func.func @transform_2(%arg0: i32) -> (i32, i32) {
    %c0_i32 = arith.constant 0 : i32
    %c0_i32_0 = arith.constant 0 : i32
    %c0_i32_1 = arith.constant 0 : i32
    return %c0_i32, %c0_i32_0 : i32, i32
  }
  func.func @transform_3(%arg0: i32) -> (i32, i32) {
    %c0_i32 = arith.constant 0 : i32
    %c0_i32_0 = arith.constant 0 : i32
    %c0_i32_1 = arith.constant 0 : i32
    return %c0_i32, %c0_i32_0 : i32, i32
  }
  func.func @transform_4(%arg0: i32) -> (i32, i32, i32) {
    %c0_i32 = arith.constant 0 : i32
    %c0_i32_0 = arith.constant 0 : i32
    %c0_i32_1 = arith.constant 0 : i32
    return %arg0, %c0_i32, %c0_i32_0 : i32, i32, i32
  }
}

</mosaic_0001>

<bundles_post_ra>
// kernel: tpu_custom_call.1
= control target key start
LH: loop header
LB: loop body
LE: loop exit
PB: predicated region body
PF: predicated region fallthrough
CT: control target
= control target key end

     0   :  { %9 = vsyncpa [#allocation3], 0  ;;  %s1763_s0 = inlined_call_operand.vmem [shape: bf16[4,32,32], index: 0, kind: input, shape index: {}]   ;;  %s1764_s1 = inlined_call_operand.vmem [shape: bf16[4,32,16], index: 1, kind: input, shape index: {}]   ;;  %s1765_s2 = inlined_call_operand.hbm [shape: bf16[464,256], index: 2, kind: input, shape index: {}]   ;;  %s1766_s3 = inlined_call_operand.vmem [shape: f32[8,128], index: 3, kind: input, shape index: {}]   ;;  %s1767_s4 = inlined_call_operand.hbm [shape: f32[4,16,128], index: 4, kind: output, shape index: {}]  }
   0x1   :  { %10 = vsyncpa [#allocation4], 0 }
   0x2   :  { %12 = vsyncpa [#allocation4 + $0x1], 0  ;;  %s1604_s15 = smov 0   ;;  %s1606_s16 = smov 0  }
   0x3   :  { %s1608_s17 = smov 0   ;;  %s1610_s18 = smov 0  }
   0x4 LB: > { %s1625_s19 = sadd.s32 4294967295, %s1568_s18   ;;  %s1196_s20 = sadd.s32 4294967294, %s1568_s18   ;;  %s1568_s18 = sphi %s1610_s18, %s1775_s18   ;;  %s1564_s17 = sphi %s1608_s17, %s1774_s17   ;;  %s1560_s16 = sphi %s1606_s16, %s1773_s16   ;;  %s1556_s15 = sphi %s1604_s15, %s1772_s15  }
   0x5   : > { %s1629_s21 = sadd.s32 1, %s1568_s18   ;;  %s119_s22 = sadd.s32 1, %s1564_s17 }
   0x6   : > { %s116_s23 = ssub.s32 %s1568_s18, %s1629_s21  ;;  %p129_p0 = scmp.ne.s32.totalorder %s1564_s17, %s1560_s16 }
   0x7   : > { %p117_p1 = scmp.eq.s32.totalorder %s116_s23, 0  ;;  %p130_p2 = scmp.eq.s32.totalorder %s1625_s19, 3 }
   0x8   : > { %p135_p3 = scmp.ne.s32.totalorder %s1560_s16, %s1556_s15  ;;  %p136_p4 = scmp.eq.s32.totalorder %s1196_s20, 3 }
   0x9   : > { %s1640_s24 = scalar_select %p117_p1, %s1564_s17, %s119_s22  }
   0xa   : > { %p1642_p5 = por %p130_p2, %p129_p0  ;;  %p1646_p6 = por %p136_p4, %p135_p3 }
   0xb   : > { %p1197_p7 = scmp.ge.s32.totalorder %s1568_s18, 1  ;;  %p143_p8 = scmp.lt.s32.totalorder %s1568_s18, 5 }
   0xc   : > { %s1769_s26 = scalar_select %p1646_p6, 1, 0 }
   0xd   : > { %p1400_p9 = scmp.eq.s32.totalorder %s1625_s19, 0  ;;  %p1653_p10 = pnand %p1197_p7, %p143_p8 }
   0xe   : > { %s1570_s28 = smov [#allocation2]  }
   0xf   : > { %s155_s29 = sshll.u32 %s1570_s28, 4  ;;  %p1392_p11 = pneg %p1653_p10  ;;  %s156_s29 = int_to_ptr.vmem [resolvable:$true] %s155_s29 }
  0x10   : > { %s1489_s30 = scalar_lea.vmem %s156_s29, 7424  ;;  %p1497_p3 = scmp.lt.s32.totalorder %s156_s29, %s156_s29 }
  0x11   : > { %p1393_p12 = pnand %p1400_p9, %p1392_p11  ;;  %p1490_p0 = scmp.ne.s32.totalorder %s156_s29, %s1489_s30 }
  0x12   : > { %p1498_p4 = scmp.lt.s32.totalorder %s1489_s30, %s1489_s30 }
  0x13   : > { %p1480_p13 = pneg %p1393_p12 }
  0x14   : > { %p1499_p6 = por %p1498_p4, %p1497_p3 }
  0x15   : > { %p1492_p1 = pnand %p1490_p0, %p1480_p13 }
  0x17   : > { %p1493_p2 = pneg %p1492_p1 }
  0x19   : > { %p1500_p7 = pnand %p1499_p6, %p1493_p2 }
  0x1b   : > { %1503 = shalt.err (!%p1500_p7)
}
  0x1c   : > { %s1571_s5 = smov 128   ;;  %s1572_s6 = smov 8  }
  0x1d   : > { %1395 = dma.hbm_to_vmem [thread:$0]  (!%p1393_p12), %s1765_s2, 7424, %s156_s29, [#allocation3], %s1571_s5, %s1571_s5, %s1572_s6  }
  0x1e   : > { %190 = sbr.rel (%p1653_p10) target bundleno = 2121 (0x849), region = 36 }
  0x23   : > { %1547 = dma.done.wait (%p1400_p9), [#allocation3], 7424  }
  0x24   : > { %1549 = vsyncadd (%p1400_p9), [#allocation3], 4294959872  ;;  %p221_p8 = scmp.lt.s32.totalorder %s1625_s19, 3  ;;  %vm268_vm0 = vcmask 261120   ;;  %v1447_v4 = vld [vmem:[#allocation2] ss:$8 sps:$4 sm:$0xff]  }
  0x25   : > { %1334 = vmatprep.subr.bf16.mxu1 %v1447_v4  ;;  %vm338_vm1 = vcmask 130048   ;;  %v1448_v11 = vld [vmem:[#allocation2 + $0x20] ss:$8 sps:$4 sm:$0xff]   ;;  %v1449_v12 = vld [vmem:[#allocation2 + $0x10] ss:$8 sps:$4 sm:$0xff]   ;;  %vm1575_vm2 = vmmov 0  }
  0x26   : > { %s222_s9 = scalar_select %p221_p8, %s1625_s19, 3  ;;  %1335 = vmatpush3.bf16.msra.mxu1 %v1447_v4  ;;  %v1213_v15 = vld [vmem:[%s1766_s3] ss:$0 sm:$0xff]  ;;  %v1217_v29 = vld [vmem:[%s1766_s3 + $0x1] ss:$0 sm:$0xff] }
  0x27   : > { %1340 = vmatprep.subr.bf16.mxu1 %v1448_v11  ;;  %v1450_v43 = vld [vmem:[#allocation2 + $0x40] ss:$8 sps:$4 sm:$0xff]   ;;  %v1451_v44 = vld [vmem:[#allocation2 + $0x30] ss:$8 sps:$4 sm:$0xff]   ;;  %v1456_v4 = vld [vmem:[#allocation2 + $0x84] ss:$8 sps:$4 sm:$0xff]  }
  0x28   : > { %s1267_s10 = sshll.u32 %s222_s9, 4  ;;  %v1452_v51 = vld [vmem:[#allocation2 + $0x60] ss:$8 sps:$4 sm:$0xff]   ;;  %v1453_v52 = vld [vmem:[#allocation2 + $0x50] ss:$8 sps:$4 sm:$0xff]  }
  0x29   : > { %s230_s13 = scalar_lea.vmem %s1764_s1, %s1267_s10  ;;  %s225_s22 = scalar_lea.vmem %s1763_s0, %s1267_s10  ;;  %v1224_v55 = vld [vmem:[%s1766_s3 + $0x2] ss:$0 sm:$0xff] }
  0x2a   : > { %v1443_v0 = vld [vmem:[%s230_s13 + $0x8] sm:$0xff]   ;;  %v1444_v1 = vld [vmem:[%s230_s13] sm:$0xff]   ;;  %s218_s10 = sand.u32 1, %s1560_s16  }
  0x2b   : > { %1326 = vmatprep.subr.bf16.mxu0 %v1443_v0  ;;  %v1445_v2 = vld [vmem:[%s225_s22] sm:$0xff]   ;;  %v1446_v3 = vld [vmem:[%s225_s22 + $0x8] sm:$0xff]   ;;  %s1202_s11 = sshll.u32 %s218_s10, 4  ;;  %s1269_s22 = sshll.u32 %s1625_s19, 8 }
  0x2c   : > { %1327 = vmatpush3.bf16.msra.mxu0 %v1443_v0  ;;  %1330 = vmatprep.mubr.msk.bf16.mxu0 %vm268_vm0, %v1445_v2  ;;  %s220_s14 = scalar_lea.vmem [#allocation5], %s1202_s11  ;;  %s1721_s28 = scalar_lea.hbm %s1767_s4, %s1269_s22 }
  0x2d   : > { %1328 = vmatprep.subr.bf16.mxu0 %v1444_v1  ;;  %s1110_s20 = sshll.u32 %s220_s14, 4  ;;  %s1723_s29 = scalar_lea.sflag [#allocation4], %s218_s10  ;;  %s1716_s20 = int_to_ptr.vmem [resolvable:$true] %s1110_s20 }
  0x2e   : > { %s1504_s30 = scalar_lea.vmem %s1716_s20, 256  ;;  %s1576_s19 = smov [#allocation5]  }
  0x2f   : > { %p1505_p6 = scmp.ne.s32.totalorder %s1716_s20, %s1504_s30  ;;  %s1508_s5 = sshll.u32 %s1576_s19, 4  ;;  %s1509_s5 = int_to_ptr.vmem [resolvable:$false] %s1508_s5 }
  0x30   : > { %1329 = vmatpush3.bf16.msra.mxu0 %v1444_v1  ;;  %s1510_s6 = scalar_lea.vmem %s1509_s5, 512  ;;  %p1511_p11 = scmp.lt.s32.totalorder %s1716_s20, %s1509_s5 }
  0x31   : > { %1364 = vmatprep.subr.bf16.mxu0 %v1452_v51  ;;  %p1506_p9 = pnand %p1505_p6, %p1642_p5  ;;  %p1512_p12 = scmp.lt.s32.totalorder %s1510_s6, %s1504_s30 }
  0x33   : > { %1331 = vmatmul.mubr.msk.bf16.vlgmr.msra.gmra.mxu0 %vm268_vm0, %v1446_v3  ;;  %p1507_p10 = pneg %p1506_p9  ;;  %p1513_p13 = por %p1512_p12, %p1511_p11 }
  0x34   : > { %1365 = vmatpush3.bf16.msra.mxu0 %v1452_v51 }
  0x35   : > { %1366 = vmatprep.subr.bf16.mxu0 %v1453_v52  ;;  %p1514_p0 = pnand %p1513_p13, %p1507_p10 }
  0x38   : > { %1367 = vmatpush3.bf16.msra.mxu0 %v1453_v52 }
  0xf3   : > { %v1332_v5 = vpop.f32.mrf.mxu0 }
  0xf5   : > { %v309_v6 = vpop.f32.mrf.mxu0 }
  0xf7   : > { %v1333_v7 = vpop.f32.mrf.mxu0 }
  0xf8   : > { %v325_v10 = vpack.c.bf16 %v1333_v7, %v1332_v5  ;;  %v1454_v5 = vld [vmem:[#allocation2 + $0x80] ss:$8 sps:$4 sm:$0xff]   ;;  %v1457_v7 = vld [vmem:[#allocation2 + $0x70] ss:$8 sps:$4 sm:$0xff]  }
  0xf9   : > { %v312_v8 = vpop.f32.mrf.mxu0 }
  0xfa   : > { %v324_v9 = vpack.c.bf16 %v312_v8, %v309_v6  ;;  %v1459_v6 = vld [vmem:[#allocation2 + $0x74] ss:$8 sps:$4 sm:$0xff]   ;;  %v1573_v8 = vmov 0  }
  0xfc   : > { %1336 = vmatprep.mubr.msk.bf16.mxu1 %vm338_vm1, %v324_v9  ;;  %v1460_v9 = vld [vmem:[#allocation2 + $0x1b0] ss:$8 sps:$4 sm:$0xff]  }
  0xfd   : > { %1337 = vmatmul.mubr.msk.bf16.vlgmr.msra.gmra.mxu1 %vm338_vm1, %v325_v10  ;;  %v1461_v10 = vld [vmem:[#allocation2 + $0x130] ss:$8 sps:$4 sm:$0xff]   ;;  %1293 = vmatprep.subr.bf16.mxu0 %v1460_v9 }
  0xfe   : > { %1341 = vmatpush3.bf16.msra.mxu1 %v1448_v11  ;;  %v1462_v11 = vld [vmem:[#allocation2 + $0x1a0] ss:$8 sps:$4 sm:$0xff]  }
  0xff   : > { %1342 = vmatprep.subr.bf16.mxu1 %v1449_v12 }
 0x102   : > { %1343 = vmatpush3.bf16.msra.mxu1 %v1449_v12  ;;  %v1463_v12 = vld [vmem:[#allocation2 + $0x120] ss:$8 sps:$4 sm:$0xff]  }
 0x1bd   : > { %v1338_v13 = vpop.f32.mrf.mxu1 }
 0x1be   : > { %v388_v19 = vadd.f32 %v1338_v13, %v1213_v15  ;;  %v1464_v13 = vld [vmem:[#allocation2 + $0x190] ss:$8 sps:$4 sm:$0xff]  }
 0x1bf   : > { %v379_v14 = vpop.f32.mrf.mxu1 }
 0x1c0   : > { %v380_v17 = vadd.f32 %v1213_v15, %v379_v14  ;;  %v396_v25 = vmax.f32 %v388_v19, 0.0  ;;  %v1465_v14 = vld [vmem:[#allocation2 + $0x110] ss:$8 sps:$4 sm:$0xff]  }
 0x1c1   : > { %v1339_v16 = vpop.f32.mrf.mxu1 }
 0x1c2   : > { %v391_v18 = vadd.f32 %v1339_v16, %v1213_v15  ;;  %v394_v23 = vmax.f32 %v380_v17, 0.0  ;;  %v1467_v16 = vld [vmem:[#allocation2 + $0x100] ss:$8 sps:$4 sm:$0xff]   ;;  %v1468_v17 = vld [vmem:[#allocation2 + $0x170] ss:$8 sps:$4 sm:$0xff]  }
 0x1c3   : > { %v382_v20 = vpop.f32.mrf.mxu1 }
 0x1c4   : > { %v383_v21 = vadd.f32 %v1213_v15, %v382_v20  ;;  %v397_v22 = vmax.f32 %v391_v18, 0.0  ;;  %v1466_v15 = vld [vmem:[#allocation2 + $0x180] ss:$8 sps:$4 sm:$0xff]   ;;  %v1469_v18 = vld [vmem:[#allocation2 + $0xf0] ss:$8 sps:$4 sm:$0xff]  }
 0x1c6   : > { %v395_v24 = vmax.f32 %v383_v21, 0.0  ;;  %v399_v27 = vpack.c.bf16 %v397_v22, %v396_v25  ;;  %v1229_v21 = vld [vmem:[%s1766_s3 + $0x3] ss:$0 sm:$0xff] }
 0x1c8   : > { %v398_v26 = vpack.c.bf16 %v395_v24, %v394_v23 }
 0x1ca   : > { %1344 = vmatprep.mubr.msk.bf16.mxu1 %vm268_vm0, %v398_v26 }
 0x1cb   : > { %1345 = vmatmul.mubr.msk.bf16.vlgmr.msra.gmra.mxu1 %vm268_vm0, %v399_v27 }
 0x1cc   : > { %1352 = vmatprep.mubr.msk.bf16.mxu1 %vm268_vm0, %v1445_v2 }
 0x28b   : > { %v1346_v28 = vpop.f32.mrf.mxu1 }
 0x28c   : > { %v469_v31 = vadd.f32 %v1346_v28, %v1217_v29 }
 0x28d   : > { %v460_v30 = vpop.f32.mrf.mxu1 }
 0x28e   : > { %v461_v33 = vadd.f32 %v1217_v29, %v460_v30  ;;  %v477_v36 = vmax.f32 %v469_v31, 0.0 }
 0x28f   : > { %v1347_v32 = vpop.f32.mrf.mxu1 }
 0x290   : > { %v472_v34 = vadd.f32 %v1347_v32, %v1217_v29  ;;  %v475_v39 = vmax.f32 %v461_v33, 0.0 }
 0x291   : > { %v463_v35 = vpop.f32.mrf.mxu1 }
 0x292   : > { %v478_v37 = vmax.f32 %v472_v34, 0.0  ;;  %v464_v38 = vadd.f32 %v1217_v29, %v463_v35  ;;  %v1470_v34 = vld [vmem:[#allocation2 + $0x160] ss:$8 sps:$4 sm:$0xff]  }
 0x293   : > { %v1471_v35 = vld [vmem:[#allocation2 + $0xe0] ss:$8 sps:$4 sm:$0xff]  }
 0x294   : > { %v480_v40 = vpack.c.bf16 %v478_v37, %v477_v36  ;;  %v476_v41 = vmax.f32 %v464_v38, 0.0  ;;  %v1472_v36 = vld [vmem:[#allocation2 + $0x150] ss:$8 sps:$4 sm:$0xff]   ;;  %v1474_v38 = vld [vmem:[#allocation2 + $0x140] ss:$8 sps:$4 sm:$0xff]  }
 0x295   : > { %v1473_v37 = vld [vmem:[#allocation2 + $0xd0] ss:$8 sps:$4 sm:$0xff]  }
 0x296   : > { %v479_v42 = vpack.c.bf16 %v476_v41, %v475_v39  ;;  %1348 = vmatprep.subr.bf16.mxu1 %v480_v40  ;;  %v1475_v39 = vld [vmem:[#allocation2 + $0xc0] ss:$8 sps:$4 sm:$0xff]  }
 0x297   : > { %1349 = vmatpush3.bf16.msra.mxu1 %v480_v40  ;;  %v778_v40 = vld [vmem:[#allocation2 + $0xa8] sm:$0xff] }
 0x298   : > { %1350 = vmatprep.subr.bf16.mxu1 %v479_v42 }
 0x29b   : > { %1351 = vmatpush3.bf16.msra.mxu1 %v479_v42  ;;  %v777_v42 = vld [vmem:[#allocation2 + $0xa0] sm:$0xff] }
 0x29c   : > { %1356 = vmatprep.subr.bf16.mxu1 %v1450_v43 }
 0x29e   : > { %1353 = vmatmul.mubr.msk.bf16.vlgmr.msra.gmra.mxu1 %vm268_vm0, %v1446_v3 }
 0x29f   : > { %1357 = vmatpush3.bf16.msra.mxu1 %v1450_v43 }
 0x2a0   : > { %1358 = vmatprep.subr.bf16.mxu1 %v1451_v44 }
 0x2a3   : > { %1359 = vmatpush3.bf16.msra.mxu1 %v1451_v44  ;;  %v783_v44 = vunpack.c.l.bf16 %v778_v40 }
 0x2a4   : > { %736 = vmatprep.subr.bf16.mxu1 %v1456_v4 }
 0x35e   : > { %v1354_v45 = vpop.f32.mrf.mxu1 }
 0x360   : > { %v515_v46 = vpop.f32.mrf.mxu1 }
 0x362   : > { %v1355_v47 = vpop.f32.mrf.mxu1 }
 0x363   : > { %v531_v50 = vpack.c.bf16 %v1355_v47, %v1354_v45  ;;  %v782_v45 = vunpack.c.h.bf16 %v777_v42  ;;  %v781_v47 = vunpack.c.l.bf16 %v777_v42 }
 0x364   : > { %v518_v48 = vpop.f32.mrf.mxu1 }
 0x365   : > { %v530_v49 = vpack.c.bf16 %v518_v48, %v515_v46  ;;  %v784_v46 = vunpack.c.h.bf16 %v778_v40 }
 0x367   : > { %1360 = vmatprep.mubr.msk.bf16.mxu1 %vm268_vm0, %v530_v49 }
 0x368   : > { %1361 = vmatmul.mubr.msk.bf16.vlgmr.msra.gmra.mxu1 %vm268_vm0, %v531_v50 }
 0x369   : > { %737 = vmatpush1.bf16.msra.mxu1 %v1454_v5  ;;  %756 = vmatprep.mubr.bf16.mxu1 %v1573_v8 }
 0x36a   : > { %738 = vmatprep.subr.bf16.mxu1 %v1459_v6 }
 0x36d   : > { %739 = vmatpush1.bf16.msra.mxu1 %v1457_v7 }
 0x428   : > { %v1362_v53 = vpop.f32.mrf.mxu1 }
 0x429   : > { %v601_v59 = vadd.f32 %v1362_v53, %v1224_v55  ;;  %v780_v53 = vld [vmem:[#allocation2 + $0xb8] sm:$0xff] }
 0x42a   : > { %v592_v54 = vpop.f32.mrf.mxu1 }
 0x42b   : > { %v593_v57 = vadd.f32 %v1224_v55, %v592_v54  ;;  %v609_v1 = vmax.f32 %v601_v59, 0.0 }
 0x42c   : > { %v1363_v56 = vpop.f32.mrf.mxu1 }
 0x42d   : > { %v604_v58 = vadd.f32 %v1363_v56, %v1224_v55  ;;  %v607_v63 = vmax.f32 %v593_v57, 0.0  ;;  %v779_v57 = vld [vmem:[#allocation2 + $0xb0] sm:$0xff] }
 0x42e   : > { %v595_v60 = vpop.f32.mrf.mxu1 }
 0x42f   : > { %v596_v61 = vadd.f32 %v1224_v55, %v595_v60  ;;  %v610_v62 = vmax.f32 %v604_v58, 0.0  ;;  %v787_v60 = vunpack.c.l.bf16 %v780_v53 }
 0x431   : > { %v608_v0 = vmax.f32 %v596_v61, 0.0  ;;  %v612_v3 = vpack.c.bf16 %v610_v62, %v609_v1  ;;  %v786_v61 = vunpack.c.h.bf16 %v779_v57  ;;  %v788_v62 = vunpack.c.h.bf16 %v780_v53 }
 0x433   : > { %v611_v2 = vpack.c.bf16 %v608_v0, %v607_v63  ;;  %v785_v63 = vunpack.c.l.bf16 %v779_v57 }
 0x435   : > { %1368 = vmatprep.mubr.msk.bf16.mxu0 %vm268_vm0, %v611_v2 }
 0x436   : > { %1369 = vmatmul.mubr.msk.bf16.vlgmr.msra.gmra.mxu0 %vm268_vm0, %v612_v3 }
 0x437   : > { %1294 = vmatpush3.bf16.msra.mxu0 %v1461_v10 }
 0x438   : > { %1295 = vmatprep.subr.bf16.mxu0 %v1462_v11 }
 0x43b   : > { %1296 = vmatpush3.bf16.msra.mxu0 %v1463_v12 }
 0x43c   : > { %1297 = vmatprep.subr.bf16.mxu0 %v1464_v13 }
 0x43f   : > { %1298 = vmatpush3.bf16.msra.mxu0 %v1465_v14 }
 0x440   : > { %1299 = vmatprep.subr.bf16.mxu0 %v1466_v15 }
 0x443   : > { %1300 = vmatpush3.bf16.msra.mxu0 %v1467_v16 }
 0x444   : > { %1301 = vmatprep.subr.bf16.mxu0 %v1468_v17 }
 0x447   : > { %1302 = vmatpush3.bf16.msra.mxu0 %v1469_v18 }
 0x448   : > { %1303 = vmatprep.subr.bf16.mxu0 %v1470_v34 }
 0x44b   : > { %1304 = vmatpush3.bf16.msra.mxu0 %v1471_v35  ;;  %v1259_v35 = vld [vmem:[%s1766_s3 + $0x5] ss:$0 sm:$0xff] }
 0x44c   : > { %1305 = vmatprep.subr.bf16.mxu0 %v1472_v36 }
 0x44f   : > { %1306 = vmatpush3.bf16.msra.mxu0 %v1473_v37 }
 0x450   : > { %1307 = vmatprep.subr.bf16.mxu0 %v1474_v38 }
 0x453   : > { %1308 = vmatpush3.bf16.msra.mxu0 %v1475_v39 }
 0x4f6   : > { %v1370_v19 = vpop.f32.mrf.mxu0 }
 0x4f7   : > { %v682_v30 = vadd.f32 %v1370_v19, %v1229_v21 }
 0x4f8   : > { %v673_v20 = vpop.f32.mrf.mxu0 }
 0x4f9   : > { %v674_v23 = vadd.f32 %v1229_v21, %v673_v20  ;;  %v690_v32 = vmax.f32 %v682_v30, 0.0 }
 0x4fa   : > { %v1371_v22 = vpop.f32.mrf.mxu0 }
 0x4fb   : > { %v688_v26 = vmax.f32 %v674_v23, 0.0  ;;  %v685_v28 = vadd.f32 %v1371_v22, %v1229_v21  ;;  %v1476_v23 = vld [vmem:[#allocation2 + $0x1c0] ss:$8 sps:$4 sm:$0xff]  }
 0x4fc   : > { %v676_v24 = vpop.f32.mrf.mxu0 }
 0x4fd   : > { %v677_v25 = vadd.f32 %v1229_v21, %v676_v24  ;;  %v691_v31 = vmax.f32 %v685_v28, 0.0  ;;  %v1477_v24 = vld [vmem:[#allocation2 + $0x90] ss:$8 sps:$4 sm:$0xff]  }
 0x4ff   : > { %v689_v27 = vmax.f32 %v677_v25, 0.0  ;;  %v693_v33 = vpack.c.bf16 %v691_v31, %v690_v32  ;;  %v1256_v25 = vld [vmem:[%s1766_s3 + $0x4] ss:$0 sm:$0xff] }
 0x501   : > { %v692_v29 = vpack.c.bf16 %v689_v27, %v688_v26 }
 0x503   : > { %1238 = vmatmul.mubr.msk.bf16.vlgmr.msra.gmra.mxu1 %vm268_vm0, %v692_v29 }
 0x504   : > { %766 = vmatprep.mubr.bf16.mxu1 %v1573_v8  ;;  %v1574_v8 = vmov 0.0  }
 0x505   : > { %1372 = vmatprep.subr.bf16.mxu1 %v1574_v8 }
 0x50b   : > { %1239 = vmatmul.mubr.msk.bf16.gmra.mxu1 %vm268_vm0, %v693_v33 }
 0x50c   : > { %1376 = vmatprep.mubr.msk.bf16.mxu1 %vm1575_vm2, %v1574_v8 }
 0x5c3   : > { %v758_v41 = vpop.f32.mrf.mxu1 }
 0x5c4   : > { %v789_v54 = vmul.f32 %v781_v47, %v758_v41 }
 0x5c5   : > { %v760_v43 = vpop.f32.mrf.mxu1 }
 0x5c6   : > { %v790_v51 = vmul.f32 %v782_v45, %v760_v43 }
 0x5c7   : > { %v762_v48 = vpop.f32.mrf.mxu1 }
 0x5c8   : > { %v791_v49 = vmul.f32 %v783_v44, %v762_v48 }
 0x5c9   : > { %v764_v50 = vpop.f32.mrf.mxu1 }
 0x5ca   : > { %v792_v52 = vmul.f32 %v784_v46, %v764_v50  ;;  %v797_v58 = vpack.c.bf16 %v791_v49, %v789_v54 }
 0x5cb   : > { %v768_v55 = vpop.f32.mrf.mxu1 }
 0x5cc   : > { %v798_v56 = vpack.c.bf16 %v792_v52, %v790_v51  ;;  %v793_v5 = vmul.f32 %v785_v63, %v768_v55 }
 0x5cd   : > { %v770_v59 = vpop.f32.mrf.mxu1 }
 0x5ce   : > { %961 = vmatprep.mubr.bf16.mxu0 %v798_v56  ;;  %v794_v3 = vmul.f32 %v786_v61, %v770_v59 }
 0x5cf   : > { %v772_v0 = vpop.f32.mrf.mxu1  ;;  %962 = vmatmul.mubr.bf16.vlgmr.msra.gmra.mxu0 %v797_v58 }
 0x5d0   : > { %v795_v1 = vmul.f32 %v787_v60, %v772_v0 }
 0x5d1   : > { %v774_v2 = vpop.f32.mrf.mxu1 }
 0x5d2   : > { %v796_v4 = vmul.f32 %v788_v62, %v774_v2  ;;  %v799_v7 = vpack.c.bf16 %v795_v1, %v793_v5 }
 0x5d4   : > { %v800_v6 = vpack.c.bf16 %v796_v4, %v794_v3 }
 0x5d6   : > { %969 = vmatprep.mubr.bf16.mxu0 %v800_v6 }
 0x5d7   : > { %970 = vmatmul.mubr.bf16.gmra.mxu0 %v799_v7 }
 0x68f   : > { %v1309_v9 = vpop.f32.mrf.mxu0 }
 0x691   : > { %v1310_v10 = vpop.f32.mrf.mxu0 }
 0x692   : > { %v1311_v21 = vadd.f32 %v1310_v10, %v1309_v9 }
 0x693   : > { %v1312_v11 = vpop.f32.mrf.mxu0 }
 0x695   : > { %v1313_v12 = vpop.f32.mrf.mxu0 }
 0x696   : > { %v1314_v19 = vadd.f32 %v1313_v12, %v1312_v11 }
 0x697   : > { %v1315_v13 = vpop.f32.mrf.mxu0 }
 0x698   : > { %v978_v22 = vpack.c.bf16 %v1314_v19, %v1311_v21 }
 0x699   : > { %v1316_v14 = vpop.f32.mrf.mxu0 }
 0x69a   : > { %v1317_v17 = vadd.f32 %v1316_v14, %v1315_v13 }
 0x69b   : > { %v1318_v15 = vpop.f32.mrf.mxu0 }
 0x69d   : > { %v1319_v16 = vpop.f32.mrf.mxu0 }
 0x69e   : > { %v1320_v18 = vadd.f32 %v1319_v16, %v1318_v15 }
 0x6a0   : > { %v979_v20 = vpack.c.bf16 %v1320_v18, %v1317_v17 }
 0x6a2   : > { %1373 = vmatpush3.bf16.msra.mxu1 %v979_v20 }
 0x6a3   : > { %1374 = vmatprep.subr.bf16.mxu1 %v1574_v8 }
 0x6a6   : > { %1375 = vmatpush3.bf16.msra.mxu1 %v978_v22 }
 0x6a7   : > { %1380 = vmatprep.subr.bf16.mxu1 %v1574_v8 }
 0x6a9   : > { %1377 = vmatmul.mubr.msk.bf16.vlgmr.msra.gmra.mxu1 %vm268_vm0, %v1476_v23 }
 0x6aa   : > { %1382 = vmatprep.mubr.msk.bf16.mxu1 %vm1575_vm2, %v1574_v8  ;;  %1381 = vmatpush3.bf16.msra.mxu1 %v1477_v24 }
 0x769   : > { %v1028_v26 = vpop.f32.mrf.mxu1 }
 0x76a   : > { %v1029_v28 = vadd.f32 %v1256_v25, %v1028_v26 }
 0x76b   : > { %v1378_v27 = vpop.f32.mrf.mxu1 }
 0x76c   : > { %v1035_v32 = vmax.f32 %v1029_v28, 0.0 }
 0x76d   : > { %v1031_v29 = vpop.f32.mrf.mxu1 }
 0x76e   : > { %v1032_v30 = vadd.f32 %v1256_v25, %v1031_v29 }
 0x76f   : > { %v1379_v31 = vpop.f32.mrf.mxu1 }
 0x770   : > { %v1036_v33 = vmax.f32 %v1032_v30, 0.0 }
 0x772   : > { %v1037_v34 = vpack.c.bf16 %v1036_v33, %v1035_v32 }
 0x774   : > { %1383 = vmatmul.mubr.msk.bf16.vlgmr.msra.gmra.mxu1 %vm338_vm1, %v1037_v34 }
 0x834   : > { %v1087_v36 = vpop.f32.mrf.mxu1 }
 0x835   : > { %v1088_v37 = vadd.f32 %v1259_v35, %v1087_v36 }
 0x836   : > { %v1384_v38 = vpop.f32.mrf.mxu1 }
 0x837   : > { %1094 = vst [vmem:[%s220_s14] sm:$0xff] %v1088_v37 }
 0x838   : > { %v1090_v39 = vpop.f32.mrf.mxu1 }
 0x839   : > { %v1091_v40 = vadd.f32 %v1259_v35, %v1090_v39 }
 0x83a   : > { %v1385_v41 = vpop.f32.mrf.mxu1 }
 0x83b   : > { %1095 = vst [vmem:[%s220_s14 + $0x8] sm:$0xff] %v1091_v40 }
 0x83c   : > { %1517 = shalt.err (!%p1514_p0)
}
 0x83d   : > { %s1518_s7 = scalar_lea.hbm %s1721_s28, 256  ;;  %s1522_s10 = scalar_lea.hbm %s1767_s4, 1024 }
 0x83e   : > { %p1519_p1 = scmp.ne.s32.totalorder %s1721_s28, %s1518_s7  ;;  %p1523_p4 = scmp.lt.s32.totalorder %s1721_s28, %s1767_s4 }
 0x83f   : > { %p1524_p7 = scmp.lt.s32.totalorder %s1522_s10, %s1518_s7 }
 0x840   : > { %p1520_p2 = pnand %p1519_p1, %p1642_p5 }
 0x841   : > { %p1525_p8 = por %p1524_p7, %p1523_p4 }
 0x842   : > { %p1521_p3 = pneg %p1520_p2 }
 0x844   : > { %p1526_p6 = pnand %p1525_p8, %p1521_p3 }
 0x846   : > { %1529 = shalt.err (!%p1526_p6)
}
 0x847   : > { %s1577_s13 = smov 128   ;;  %s1578_s14 = smov 8  }
 0x848   : > { %1390 = dma.vmem_to_hbm [thread:$0]  (%p1642_p5), %s1716_s20, 256, %s1721_s28, %s1723_s29, %s1577_s13, %s1577_s13, %s1578_s14  }
 0x849 PF: > { %p1402_p9 = scmp.ge.s32.totalorder %s1568_s18, 2  ;;  %s1125_s22 = sand.u32 1, %s1556_s15  }
 0x84a   : > { %p1771_p10 = scmp.ne.s32.totalorder %s1769_s26, 0  ;;  %s1126_s23 = scalar_lea.sflag [#allocation4], %s1125_s22 }
 0x84c   : > { %p1397_p11 = pnand %p1402_p9, %p1771_p10 }
 0x84e   : > { %p1398_p12 = pneg %p1397_p11 }
 0x850   : > { %1551 = dma.done.wait (%p1398_p12), %s1126_s23, 256  }
 0x851   : > { %1553 = vsyncadd (%p1398_p12), %s1126_s23, 4294967040  ;;  %p15_p13 = scmp.ge.s32.totalorder %s1629_s21, 6   ;;  %s1772_s15 = smov %s1560_s16 }
 0x852   : > { %s1773_s16 = smov %s1564_s17  ;;  %s1774_s17 = smov %s1640_s24 }
 0x853   : > { %s1775_s18 = smov %s1629_s21  ;;  %17 = sbr.rel (!%p15_p13) target bundleno = 4 (0x4), region = 79 }
 0x858   :  { %1131 = vsyncpa [#allocation3], 1 }
 0x859   :  { %1133 = vsyncpa [#allocation3 + $0x1], 1 }
 0x85a   :  { %1134 = vsyncpa [#allocation4], 1 }
 0x85b   :  { %1136 = vsyncpa [#allocation4 + $0x1], 1 }

</bundles_post_ra>
